<compile_context>
chip_gen: v7x
topology: tpu7x:2x2x1
jax: 0.10.0
libtpu: 0.0.40
codegen_flags: <defaults>
</compile_context>

<pallas_src>
import jax
import jax.numpy as jnp
from jax.experimental import pallas as pl
from jax.experimental.pallas import tpu as pltpu


def linearnet_kernel(x_ref,
                     w1_ref, b1_ref,
                     w2_ref, b2_ref,
                     w3_ref, b3_ref,
                     w4_ref, b4_ref,
                     o_ref):
    """One batch tile of the fused 4-layer MLP (sigmoid folded into params)."""
    x = x_ref[...].astype(jnp.bfloat16)                               # (TB,128)

    h = jnp.dot(x, w1_ref[...], preferred_element_type=jnp.float32)  # (TB,64)
    h = jnp.tanh(h + b1_ref[...])

    h = jnp.dot(h.astype(jnp.bfloat16), w2_ref[...],
                preferred_element_type=jnp.float32)                   # (TB,32)
    h = jnp.tanh(h + b2_ref[...])

    h = jnp.dot(h.astype(jnp.bfloat16), w3_ref[...],
                preferred_element_type=jnp.float32)                   # (TB,16)
    h = jnp.tanh(h + b3_ref[...])

    h = jnp.dot(h.astype(jnp.bfloat16), w4_ref[...],
                preferred_element_type=jnp.float32)                   # (TB,2)
    o_ref[...] = (h + b4_ref[...]).astype(o_ref.dtype)


def _round_up(n, m):
    return ((n + m - 1) // m) * m


def fold_params(params):
    """One-time host-side transform: fold sigmoid = 0.5*(tanh(0.5 z)+1) into
    the weights/biases so the kernel only needs a bare tanh.  The colsum is
    taken on the bf16-quantized weights so it matches exactly what the MXU
    multiplies."""
    w32 = {i: params[f"w{i}"].astype(jnp.bfloat16).astype(jnp.float32)
           for i in range(1, 5)}
    b = {i: params[f"b{i}"].astype(jnp.float32) for i in range(1, 5)}

    folded = {}
    # Layer 1: t1 = tanh(x @ (0.5 W1) + 0.5 b1)
    folded["w1"] = (0.5 * w32[1]).astype(jnp.bfloat16)
    folded["b1"] = 0.5 * b[1]
    # Layers 2, 3: t_i = tanh(t_{i-1} @ (0.25 W_i) + 0.25*colsum(W_i) + 0.5 b_i)
    for i in (2, 3):
        folded[f"w{i}"] = (0.25 * w32[i]).astype(jnp.bfloat16)
        folded[f"b{i}"] = (0.25 * jnp.sum(w32[i], axis=0, keepdims=True)
                           + 0.5 * b[i])
    # Layer 4 (no activation): out = t3 @ (0.5 W4) + 0.5*colsum(W4) + b4
    folded["w4"] = (0.5 * w32[4]).astype(jnp.bfloat16)
    folded["b4"] = 0.5 * jnp.sum(w32[4], axis=0, keepdims=True) + b[4]
    return folded


def linearnet_forward(x, folded_params, *, tile_b=8192):
    """x: (B, 128) float32 (passed to the kernel unmodified). Returns (B, 2) f32."""
    B, f_in = x.shape
    assert f_in == 128

    # Batch tile: multiple of 16, capped at tile_b; prefer >=2 grid steps when
    # B is large enough so both v7x TensorCores get work.
    tb = min(tile_b, _round_up(B, 16))
    if B > 16 and pl.cdiv(B, tb) < 2:
        tb = _round_up(pl.cdiv(B, 2), 16)
    grid = (pl.cdiv(B, tb),)          # ragged tail handled by Pallas masking

    p = folded_params

    def resident(arr):
        # Full-block spec, constant index_map -> fetched once, VMEM-resident.
        return pl.BlockSpec(arr.shape, lambda i: (0,) * arr.ndim)

    return pl.pallas_call(
        linearnet_kernel,
        out_shape=jax.ShapeDtypeStruct((B, 2), jnp.float32),
        grid=grid,
        in_specs=[
            pl.BlockSpec((tb, 128), lambda i: (i, 0)),   # x: batch-tiled stream
            resident(p["w1"]), resident(p["b1"]),
            resident(p["w2"]), resident(p["b2"]),
            resident(p["w3"]), resident(p["b3"]),
            resident(p["w4"]), resident(p["b4"]),
        ],
        out_specs=pl.BlockSpec((tb, 2), lambda i: (i, 0)),
        compiler_params=pltpu.CompilerParams(
            dimension_semantics=("parallel",),
            # Explicit, generation-portable VMEM budget (v5e scoped default is
            # only 16 MiB; v7x has 64 MiB physical per TensorCore).
            vmem_limit_bytes=32 * 1024 * 1024,
        ),
    )(x, p["w1"], p["b1"], p["w2"], p["b2"],
      p["w3"], p["b3"], p["w4"], p["b4"])


def linearnet_reference(x, params):
    """Plain-JAX float32 forward matching the PyTorch module semantics."""
    h = x
    for i in range(1, 5):
        h = jnp.dot(h, params[f"w{i}"]) + params[f"b{i}"]
        if i < 4:
            h = jax.nn.sigmoid(h)
    return h


def init_params(key):
    """PyTorch nn.Linear default init: U[-1/sqrt(fan_in), 1/sqrt(fan_in)].
    Weights stored transposed: (in_features, out_features)."""
    sizes = [(2 * 64, 64), (64, 32), (32, 16), (16, 2)]
    params = {}
    keys = jax.random.split(key, 2 * len(sizes))
    for i, (fan_in, fan_out) in enumerate(sizes):
        bound = 1.0 / (fan_in ** 0.5)
        params[f"w{i + 1}"] = jax.random.uniform(
            keys[2 * i], (fan_in, fan_out),
            minval=-bound, maxval=bound, dtype=jnp.float32)
        params[f"b{i + 1}"] = jax.random.uniform(
            keys[2 * i + 1], (1, fan_out),
            minval=-bound, maxval=bound, dtype=jnp.float32)
    return params


if __name__ == "__main__":
    key = jax.random.PRNGKey(0)
    pkey, xkey = jax.random.split(key)

    params = init_params(pkey)
    folded = fold_params(params)          # one-time host-side preprocessing

    batch = 2
    x = jax.random.normal(xkey, (batch, 2 * 64), dtype=jnp.float32)

    out = jax.block_until_ready(linearnet_forward(x, folded))

    ref = linearnet_reference(x, params)
    assert out.shape == (batch, 2)
    # MXU operands are bf16, so allow bf16-level error vs. the f32 reference.
    assert jnp.allclose(out, ref, atol=5e-2, rtol=5e-2), (
        f"max abs err {jnp.max(jnp.abs(out - ref))}")

    print("KERNEL_OK")
</pallas_src>

<mosaic_0001>
module attributes {stable_mosaic.version = 11 : i64} {
  func.func @linearnet_kernel(%arg0: i32, %arg1: memref<16x128xf32, #tpu.memory_space<vmem>>, %arg2: memref<128x64xbf16, #tpu.memory_space<vmem>>, %arg3: memref<1x64xf32, #tpu.memory_space<vmem>>, %arg4: memref<64x32xbf16, #tpu.memory_space<vmem>>, %arg5: memref<1x32xf32, #tpu.memory_space<vmem>>, %arg6: memref<32x16xbf16, #tpu.memory_space<vmem>>, %arg7: memref<1x16xf32, #tpu.memory_space<vmem>>, %arg8: memref<16x2xbf16, #tpu.memory_space<vmem>>, %arg9: memref<1x2xf32, #tpu.memory_space<vmem>>, %arg10: memref<16x2xf32, #tpu.memory_space<vmem>>) attributes {dimension_semantics = [#tpu.dimension_semantics<parallel>], iteration_bounds = array<i64: 1>, scalar_prefetch = 0 : i64, scratch_operands = 0 : i64, tpu.core_type = #tpu.core_type<tc>, window_params = [{transform_indices = @transform_0, window_bounds = array<i64: 16, 128>}, {pipeline_mode = #tpu.pipeline_mode<synchronous>, transform_indices = @transform_1, window_bounds = array<i64: 128, 64>}, {pipeline_mode = #tpu.pipeline_mode<synchronous>, transform_indices = @transform_2, window_bounds = array<i64: 1, 64>}, {pipeline_mode = #tpu.pipeline_mode<synchronous>, transform_indices = @transform_3, window_bounds = array<i64: 64, 32>}, {pipeline_mode = #tpu.pipeline_mode<synchronous>, transform_indices = @transform_4, window_bounds = array<i64: 1, 32>}, {pipeline_mode = #tpu.pipeline_mode<synchronous>, transform_indices = @transform_5, window_bounds = array<i64: 32, 16>}, {pipeline_mode = #tpu.pipeline_mode<synchronous>, transform_indices = @transform_6, window_bounds = array<i64: 1, 16>}, {pipeline_mode = #tpu.pipeline_mode<synchronous>, transform_indices = @transform_7, window_bounds = array<i64: 16, 2>}, {pipeline_mode = #tpu.pipeline_mode<synchronous>, transform_indices = @transform_8, window_bounds = array<i64: 1, 2>}, {transform_indices = @transform_9, window_bounds = array<i64: 16, 2>}]} {
    %c0 = arith.constant 0 : index
    %c0_0 = arith.constant 0 : index
    %0 = vector.load %arg1[%c0, %c0_0] : memref<16x128xf32, #tpu.memory_space<vmem>>, vector<16x128xf32>
    %1 = arith.truncf %0 : vector<16x128xf32> to vector<16x128xbf16>
    %c0_1 = arith.constant 0 : index
    %c0_2 = arith.constant 0 : index
    %2 = vector.load %arg2[%c0_1, %c0_2] : memref<128x64xbf16, #tpu.memory_space<vmem>>, vector<128x64xbf16>
    %cst = arith.constant dense<0.000000e+00> : vector<16x64xf32>
    %3 = tpu.matmul %1, %2, %cst {dimension_numbers = #tpu.dot_dimension_numbers<[1], [0], [0], [1], [0, 0, 1, 1], [], []>} : vector<16x128xbf16>, vector<128x64xbf16>, vector<16x64xf32> -> vector<16x64xf32>
    %c0_3 = arith.constant 0 : index
    %c0_4 = arith.constant 0 : index
    %4 = vector.load %arg3[%c0_3, %c0_4] : memref<1x64xf32, #tpu.memory_space<vmem>>, vector<1x64xf32>
    %5 = vector.broadcast %4 : vector<1x64xf32> to vector<16x64xf32>
    %6 = arith.addf %3, %5 : vector<16x64xf32>
    %7 = math.tanh %6 : vector<16x64xf32>
    %8 = arith.truncf %7 : vector<16x64xf32> to vector<16x64xbf16>
    %c0_5 = arith.constant 0 : index
    %c0_6 = arith.constant 0 : index
    %9 = vector.load %arg4[%c0_5, %c0_6] : memref<64x32xbf16, #tpu.memory_space<vmem>>, vector<64x32xbf16>
    %cst_7 = arith.constant dense<0.000000e+00> : vector<16x32xf32>
    %10 = tpu.matmul %8, %9, %cst_7 {dimension_numbers = #tpu.dot_dimension_numbers<[1], [0], [0], [1], [0, 0, 1, 1], [], []>} : vector<16x64xbf16>, vector<64x32xbf16>, vector<16x32xf32> -> vector<16x32xf32>
    %c0_8 = arith.constant 0 : index
    %c0_9 = arith.constant 0 : index
    %11 = vector.load %arg5[%c0_8, %c0_9] : memref<1x32xf32, #tpu.memory_space<vmem>>, vector<1x32xf32>
    %12 = vector.broadcast %11 : vector<1x32xf32> to vector<16x32xf32>
    %13 = arith.addf %10, %12 : vector<16x32xf32>
    %14 = math.tanh %13 : vector<16x32xf32>
    %15 = arith.truncf %14 : vector<16x32xf32> to vector<16x32xbf16>
    %c0_10 = arith.constant 0 : index
    %c0_11 = arith.constant 0 : index
    %16 = vector.load %arg6[%c0_10, %c0_11] : memref<32x16xbf16, #tpu.memory_space<vmem>>, vector<32x16xbf16>
    %cst_12 = arith.constant dense<0.000000e+00> : vector<16x16xf32>
    %17 = tpu.matmul %15, %16, %cst_12 {dimension_numbers = #tpu.dot_dimension_numbers<[1], [0], [0], [1], [0, 0, 1, 1], [], []>} : vector<16x32xbf16>, vector<32x16xbf16>, vector<16x16xf32> -> vector<16x16xf32>
    %c0_13 = arith.constant 0 : index
    %c0_14 = arith.constant 0 : index
    %18 = vector.load %arg7[%c0_13, %c0_14] : memref<1x16xf32, #tpu.memory_space<vmem>>, vector<1x16xf32>
    %19 = vector.broadcast %18 : vector<1x16xf32> to vector<16x16xf32>
    %20 = arith.addf %17, %19 : vector<16x16xf32>
    %21 = math.tanh %20 : vector<16x16xf32>
    %22 = arith.truncf %21 : vector<16x16xf32> to vector<16x16xbf16>
    %c0_15 = arith.constant 0 : index
    %c0_16 = arith.constant 0 : index
    %23 = vector.load %arg8[%c0_15, %c0_16] : memref<16x2xbf16, #tpu.memory_space<vmem>>, vector<16x2xbf16>
    %cst_17 = arith.constant dense<0.000000e+00> : vector<16x2xf32>
    %24 = tpu.matmul %22, %23, %cst_17 {dimension_numbers = #tpu.dot_dimension_numbers<[1], [0], [0], [1], [0, 0, 1, 1], [], []>} : vector<16x16xbf16>, vector<16x2xbf16>, vector<16x2xf32> -> vector<16x2xf32>
    %c0_18 = arith.constant 0 : index
    %c0_19 = arith.constant 0 : index
    %25 = vector.load %arg9[%c0_18, %c0_19] : memref<1x2xf32, #tpu.memory_space<vmem>>, vector<1x2xf32>
    %26 = vector.broadcast %25 : vector<1x2xf32> to vector<16x2xf32>
    %27 = arith.addf %24, %26 : vector<16x2xf32>
    %c0_20 = arith.constant 0 : index
    %c0_21 = arith.constant 0 : index
    %28 = vector.load %arg10[%c0_20, %c0_21] : memref<16x2xf32, #tpu.memory_space<vmem>>, vector<16x2xf32>
    tpu.vector_store %arg10[%c0_20, %c0_21], %27 {strides = array<i32>} : memref<16x2xf32, #tpu.memory_space<vmem>>, vector<16x2xf32>,
    return
  }
  func.func @transform_0(%arg0: i32) -> (i32, i32) {
    %c0_i32 = arith.constant 0 : i32
    %c0_i32_0 = arith.constant 0 : i32
    return %arg0, %c0_i32 : i32, i32
  }
  func.func @transform_1(%arg0: i32) -> (i32, i32) {
    %c0_i32 = arith.constant 0 : i32
    %c0_i32_0 = arith.constant 0 : i32
    %c0_i32_1 = arith.constant 0 : i32
    return %c0_i32, %c0_i32_0 : i32, i32
  }
  func.func @transform_2(%arg0: i32) -> (i32, i32) {
    %c0_i32 = arith.constant 0 : i32
    %c0_i32_0 = arith.constant 0 : i32
    %c0_i32_1 = arith.constant 0 : i32
    return %c0_i32, %c0_i32_0 : i32, i32
  }
  func.func @transform_3(%arg0: i32) -> (i32, i32) {
    %c0_i32 = arith.constant 0 : i32
    %c0_i32_0 = arith.constant 0 : i32
    %c0_i32_1 = arith.constant 0 : i32
    return %c0_i32, %c0_i32_0 : i32, i32
  }
  func.func @transform_4(%arg0: i32) -> (i32, i32) {
    %c0_i32 = arith.constant 0 : i32
    %c0_i32_0 = arith.constant 0 : i32
    %c0_i32_1 = arith.constant 0 : i32
    return %c0_i32, %c0_i32_0 : i32, i32
  }
  func.func @transform_5(%arg0: i32) -> (i32, i32) {
    %c0_i32 = arith.constant 0 : i32
    %c0_i32_0 = arith.constant 0 : i32
    %c0_i32_1 = arith.constant 0 : i32
    return %c0_i32, %c0_i32_0 : i32, i32
  }
  func.func @transform_6(%arg0: i32) -> (i32, i32) {
    %c0_i32 = arith.constant 0 : i32
    %c0_i32_0 = arith.constant 0 : i32
    %c0_i32_1 = arith.constant 0 : i32
    return %c0_i32, %c0_i32_0 : i32, i32
  }
  func.func @transform_7(%arg0: i32) -> (i32, i32) {
    %c0_i32 = arith.constant 0 : i32
    %c0_i32_0 = arith.constant 0 : i32
    %c0_i32_1 = arith.constant 0 : i32
    return %c0_i32, %c0_i32_0 : i32, i32
  }
  func.func @transform_8(%arg0: i32) -> (i32, i32) {
    %c0_i32 = arith.constant 0 : i32
    %c0_i32_0 = arith.constant 0 : i32
    %c0_i32_1 = arith.constant 0 : i32
    return %c0_i32, %c0_i32_0 : i32, i32
  }
  func.func @transform_9(%arg0: i32) -> (i32, i32) {
    %c0_i32 = arith.constant 0 : i32
    %c0_i32_0 = arith.constant 0 : i32
    return %arg0, %c0_i32 : i32, i32
  }
}

</mosaic_0001>

<bundles_post_ra>
// kernel: tpu_custom_call.1
= control target key start
LH: loop header
LB: loop body
LE: loop exit
PB: predicated region body
PF: predicated region fallthrough
CT: control target
= control target key end

     0   :  { %14 = vsyncpa [#allocation3], 0  ;;  %v532_v1 = vmov 0.0   ;;  %vm533_vm0 = vmmov 0   ;;  %vm191_vm1 = vcmask 523264   ;;  %vm262_vm2 = vcmask 261120   ;;  %s685_s0 = inlined_call_operand.vmem [shape: f32[2,128], index: 0, kind: input, shape index: {}]   ;;  %s686_s1 = inlined_call_operand.vmem [shape: bf16[128,64], index: 1, kind: input, shape index: {}]   ;;  %s687_s2 = inlined_call_operand.vmem [shape: f32[1,64], index: 2, kind: input, shape index: {}]   ;;  %s688_s3 = inlined_call_operand.vmem [shape: bf16[64,32], index: 3, kind: input, shape index: {}]   ;;  %s689_s4 = inlined_call_operand.vmem [shape: f32[1,32], index: 4, kind: input, shape index: {}]   ;;  %s690_s5 = inlined_call_operand.vmem [shape: bf16[32,16], index: 5, kind: input, shape index: {}]   ;;  %s691_s6 = inlined_call_operand.vmem [shape: f32[1,16], index: 6, kind: input, shape index: {}]   ;;  %s692_s7 = inlined_call_operand.vmem [shape: bf16[16,2], index: 7, kind: input, shape index: {}]   ;;  %s693_s8 = inlined_call_operand.vmem [shape: f32[1,2], index: 8, kind: input, shape index: {}]   ;;  %s694_s9 = inlined_call_operand.hbm [shape: f32[2,2], index: 9, kind: output, shape index: {}]  }
   0x1   :  { %v481_v0 = vld [vmem:[%s686_s1] sm:$0xff]   ;;  %430 = vmatprep.subr.bf16.mxu0 %v532_v1  ;;  %450 = vmatprep.subr.bf16.mxu1 %v532_v1  ;;  %v482_v2 = vld [vmem:[%s686_s1 + $0x8] sm:$0xff]   ;;  %v483_v3 = vld [vmem:[%s686_s1 + $0x10] sm:$0xff]   ;;  %vm325_vm3 = vcmask 130048   ;;  %vm370_vm4 = vcmask 15360  }
   0x2   :  { %431 = vmatpush3.bf16.msra.mxu0 %v481_v0  ;;  %446 = vmatprep.mubr.msk.bf16.mxu0 %vm533_vm0, %v532_v1  ;;  %v484_v4 = vld [vmem:[%s686_s1 + $0x18] sm:$0xff]   ;;  %v485_v5 = vld [vmem:[%s686_s1 + $0x20] sm:$0xff]   ;;  %v486_v6 = vld [vmem:[%s686_s1 + $0x28] sm:$0xff]  }
   0x3   :  { %432 = vmatprep.subr.bf16.mxu0 %v532_v1  ;;  %458 = vmatprep.mubr.msk.bf16.mxu1 %vm533_vm0, %v532_v1  ;;  %v487_v7 = vld [vmem:[%s686_s1 + $0x30] sm:$0xff]   ;;  %v488_v8 = vld [vmem:[%s686_s1 + $0x38] sm:$0xff]   ;;  %v34_v9 = vld [vmem:[%s685_s0] sm:$0xff] }
   0x4   :  { %v35_v10 = vld [vmem:[%s685_s0 + $0x8] sm:$0xff]  ;;  %v489_v12 = vld [vmem:[%s688_s3] sm:$0xff]   ;;  %v491_v14 = vld [vmem:[%s688_s3 + $0x10] sm:$0xff]  }
   0x5   :  { %v36_v11 = vpack.c.bf16 %v35_v10, %v34_v9  ;;  %451 = vmatpush3.bf16.msra.mxu1 %v489_v12  ;;  %v490_v13 = vld [vmem:[%s688_s3 + $0x8] sm:$0xff]   ;;  %v492_v15 = vld [vmem:[%s688_s3 + $0x18] sm:$0xff]   ;;  %v389_v16 = vld [vmem:[%s687_s2] ss:$0 sm:$0xff] }
   0x6   :  { %433 = vmatpush3.bf16.msra.mxu0 %v482_v2  ;;  %452 = vmatprep.subr.bf16.mxu1 %v532_v1  ;;  %v493_v26 = vld [vmem:[%s690_s5] sm:$0xff]   ;;  %v494_v27 = vld [vmem:[%s690_s5 + $0x8] sm:$0xff]  }
   0x7   :  { %434 = vmatprep.subr.bf16.mxu0 %v532_v1  ;;  %v398_v28 = vld [vmem:[%s689_s4] ss:$0 sm:$0xff] }
   0x8   :  { %v495_v38 = vld [vmem:[%s692_s7] sm:$0xff]  }
   0x9   :  { %453 = vmatpush3.bf16.msra.mxu1 %v490_v13  ;;  %v404_v39 = vld [vmem:[%s691_s6] ss:$0 sm:$0xff] }
   0xa   :  { %435 = vmatpush3.bf16.msra.mxu0 %v483_v3  ;;  %454 = vmatprep.subr.bf16.mxu1 %v532_v1  ;;  %v408_v49 = vld [vmem:[%s693_s8] ss:$0 sm:$0xff] }
   0xb   :  { %436 = vmatprep.subr.bf16.mxu0 %v532_v1 }
   0xd   :  { %455 = vmatpush3.bf16.msra.mxu1 %v491_v14 }
   0xe   :  { %437 = vmatpush3.bf16.msra.mxu0 %v484_v4  ;;  %456 = vmatprep.subr.bf16.mxu1 %v532_v1 }
   0xf   :  { %438 = vmatprep.subr.bf16.mxu0 %v532_v1 }
  0x11   :  { %457 = vmatpush3.bf16.msra.mxu1 %v492_v15 }
  0x12   :  { %439 = vmatpush3.bf16.msra.mxu0 %v485_v5  ;;  %462 = vmatprep.subr.bf16.mxu1 %v532_v1 }
  0x13   :  { %440 = vmatprep.subr.bf16.mxu0 %v532_v1 }
  0x16   :  { %441 = vmatpush3.bf16.msra.mxu0 %v486_v6 }
  0x17   :  { %442 = vmatprep.subr.bf16.mxu0 %v532_v1 }
  0x1a   :  { %443 = vmatpush3.bf16.msra.mxu0 %v487_v7 }
  0x1b   :  { %444 = vmatprep.subr.bf16.mxu0 %v532_v1 }
  0x1e   :  { %445 = vmatpush3.bf16.msra.mxu0 %v488_v8 }
  0x21   :  { %447 = vmatmul.mubr.bf16.vlgmr.msra.gmra.mrb[0].mxu0 %v36_v11 }
  0xf4   :  { %v142_v17 = vpop.f32.mrb[0].mxu0 }
  0xf5   :  { %v143_v18 = vadd.f32 %v389_v16, %v142_v17  ;;  %v448_v19 = vpop.f32.mrb[1].mxu0 }
  0xf6   :  { %v145_v20 = vpop.f32.mrb[2].mxu0 }
  0xf7   :  { %v146_v21 = vadd.f32 %v389_v16, %v145_v20  ;;  %v449_v22 = vpop.f32.mrb[3].mxu0  ;;  %496 = vtanh.f32 %v143_v18 }
  0xf9   :  { %498 = vtanh.f32 %v146_v21 }
 0x101   :  { %v497_v23 = vpop.eup %496 }
 0x103   :  { %v499_v24 = vpop.eup %498 }
 0x104   :  { %v151_v25 = vpack.c.bf16 %v499_v24, %v497_v23 }
 0x106   :  { %459 = vmatmul.mubr.msk.bf16.vlgmr.msra.gmra.mrb[0].mxu1 %vm191_vm1, %v151_v25 }
 0x107   :  { %466 = vmatprep.mubr.msk.bf16.mxu1 %vm533_vm0, %v532_v1  ;;  %463 = vmatpush3.bf16.msra.mxu1 %v493_v26 }
 0x108   :  { %464 = vmatprep.subr.bf16.mxu1 %v532_v1 }
 0x10b   :  { %465 = vmatpush3.bf16.msra.mxu1 %v494_v27 }
 0x10c   :  { %470 = vmatprep.subr.bf16.mxu1 %v532_v1 }
 0x1d9   :  { %v229_v29 = vpop.f32.mrb[0].mxu1 }
 0x1da   :  { %v230_v30 = vadd.f32 %v398_v28, %v229_v29  ;;  %v460_v31 = vpop.f32.mrb[1].mxu1 }
 0x1db   :  { %v232_v32 = vpop.f32.mrb[2].mxu1 }
 0x1dc   :  { %v233_v33 = vadd.f32 %v398_v28, %v232_v32  ;;  %v461_v34 = vpop.f32.mrb[3].mxu1  ;;  %500 = vtanh.f32 %v230_v30 }
 0x1de   :  { %502 = vtanh.f32 %v233_v33 }
 0x1e6   :  { %v501_v35 = vpop.eup %500 }
 0x1e8   :  { %v503_v36 = vpop.eup %502 }
 0x1e9   :  { %v238_v37 = vpack.c.bf16 %v503_v36, %v501_v35 }
 0x1eb   :  { %467 = vmatmul.mubr.msk.bf16.vlgmr.msra.gmra.mrb[4].mxu1 %vm262_vm2, %v238_v37 }
 0x1ec   :  { %472 = vmatprep.mubr.msk.bf16.mxu1 %vm533_vm0, %v532_v1  ;;  %471 = vmatpush3.bf16.msra.mxu1 %v495_v38 }
 0x2be   :  { %v300_v40 = vpop.f32.mrb[4].mxu1 }
 0x2bf   :  { %v301_v41 = vadd.f32 %v404_v39, %v300_v40  ;;  %v468_v42 = vpop.f32.mrb[5].mxu1 }
 0x2c0   :  { %v303_v43 = vpop.f32.mrb[6].mxu1 }
 0x2c1   :  { %v304_v44 = vadd.f32 %v404_v39, %v303_v43  ;;  %v469_v45 = vpop.f32.mrb[7].mxu1  ;;  %504 = vtanh.f32 %v301_v41 }
 0x2c3   :  { %506 = vtanh.f32 %v304_v44 }
 0x2cb   :  { %v505_v46 = vpop.eup %504 }
 0x2cd   :  { %v507_v47 = vpop.eup %506 }
 0x2ce   :  { %v309_v48 = vpack.c.bf16 %v507_v47, %v505_v46 }
 0x2d0   :  { %473 = vmatmul.mubr.msk.bf16.vlgmr.msra.gmra.mrb[8].mxu1 %vm325_vm3, %v309_v48 }
 0x3a3   :  { %v363_v50 = vpop.f32.mrb[8].mxu1 }
 0x3a4   :  { %v364_v51 = vadd.f32 %v408_v49, %v363_v50  ;;  %v474_v52 = vpop.f32.mrb[9].mxu1 }
 0x3a5   :  { %v366_v53 = vpop.f32.mrb[10].mxu1 }
 0x3a6   :  { %371 = vst.msk [vmem:[#allocation2] sm:$0xff] %vm370_vm4, %v364_v51  ;;  %v367_v54 = vadd.f32 %v408_v49, %v366_v53  ;;  %v475_v55 = vpop.f32.mrb[11].mxu1 }
 0x3a8   :  { %372 = vst.msk [vmem:[#allocation2 + $0x8] sm:$0xff] %vm370_vm4, %v367_v54 }
 0x3a9   :  { %377 = vsyncadd [#allocation3], 224  ;;  %s534_s6 = smov [#allocation2]  }
 0x3aa   :  { %s378_s23 = sshll.u32 %s534_s6, 4  ;;  %s379_s23 = int_to_ptr.vmem [resolvable:$true] %s378_s23 }
 0x3ab   :  { %s508_s24 = scalar_lea.vmem %s379_s23, 32  ;;  %s512_s25 = scalar_lea.vmem %s379_s23, 256 }
 0x3ac   :  { %p509_p0 = scmp.ne.s32.totalorder %s379_s23, %s508_s24  ;;  %p513_p1 = scmp.lt.s32.totalorder %s379_s23, %s379_s23 }
 0x3ad   :  { %p514_p2 = scmp.lt.s32.totalorder %s512_s25, %s508_s24 }
 0x3af   :  { %p515_p3 = por %p514_p2, %p513_p1 }
 0x3b1   :  { %p516_p4 = pnand %p515_p3, %p509_p0 }
 0x3b3   :  { %519 = shalt.err (!%p516_p4)
}
 0x3b4   :  { %s520_s27 = scalar_lea.hbm %s694_s9, 32 }
 0x3b5   :  { %p521_p5 = scmp.ne.s32.totalorder %s694_s9, %s520_s27  ;;  %p524_p6 = scmp.lt.u32.totalorder %s520_s27, %s694_s9 }
 0x3b7   :  { %p526_p7 = pnand %p524_p6, %p521_p5 }
 0x3b9   :  { %529 = shalt.err (!%p526_p7)
}
 0x3ba   :  { %s535_s10 = smov 32   ;;  %s536_s11 = smov 2  }
 0x3bb   :  { %384 = dma.vmem_to_hbm [thread:$0]  %s379_s23, 32, %s694_s9, [#allocation3], %s535_s10, %s535_s10, %s536_s11  }
 0x3bc   :  { %530 = dma.done.wait [#allocation3], 256  }
 0x3bd   :  { %531 = vsyncadd [#allocation3], 4294967040 }
 0x3be   :  { %388 = vsyncpa [#allocation3], 1 }

</bundles_post_ra>
